<compile_context>
chip_gen: v7x
topology: tpu7x:2x2x1
jax: 0.10.0
libtpu: 0.0.40
codegen_flags: <defaults>
</compile_context>

<pallas_src>
import functools

import jax
import jax.numpy as jnp
import numpy as np
from jax import lax
from jax.experimental import pallas as pl
from jax.experimental.pallas import tpu as pltpu


# ----------------------------------------------------------------------------
# Parameter construction (deterministic, mirrors BaseGaussianSmoothing)
# ----------------------------------------------------------------------------
def _get_kernel_radius(sigma: float, sigma_cutoff: float) -> int:
    return max(int(sigma_cutoff * sigma + 0.5), 1)


def _gaussian_kernel_1d(sigma: float, radius: int) -> np.ndarray:
    x = np.arange(-radius, radius + 1, dtype=np.float32)
    phi = np.exp(-0.5 / (sigma * sigma) * x ** 2)
    return (phi / phi.sum()).astype(np.float32)


def make_gaussian_kernels_1d(sigma=(1.0, 1.0, 1.0), sigma_cutoff=(1.0, 1.0, 1.0),
                             radius=None, force_same_size=False):
    """Per-channel normalized 1-D taps, zero-padded to a common length K."""
    n = len(sigma)
    if radius is None:
        radii = [_get_kernel_radius(s, c) for s, c in zip(sigma, sigma_cutoff)]
    else:
        radii = list(radius)
    if force_same_size:
        radii = [max(radii)] * n
    rmax = max(radii)
    taps = []
    for s, r in zip(sigma, radii):
        k = _gaussian_kernel_1d(s, r)
        taps.append(np.pad(k, (rmax - r, rmax - r)))
    return np.stack(taps, axis=0).astype(np.float32), rmax   # (C, 2*rmax+1), rmax


def _band_matrix(k1: np.ndarray, n: int) -> np.ndarray:
    """Banded matrix B with B[i, i+off] = k1[off+r].  LEFT-multiplying (B @ x)
    applies a 1-D 'same' (zero padded) cross-correlation along that axis; for a
    right-multiplication use B^T (identical for symmetric Gaussian taps)."""
    K = k1.shape[0]
    r = K // 2
    b = np.zeros((n, n), np.float32)
    for off in range(-r, r + 1):
        idx = np.arange(max(0, -off), min(n, n - off))
        b[idx, idx + off] = k1[off + r]
    return b


def _est_vmem_bytes(td, H, W, r, itemsize):
    """Per-step VMEM working set (pipeline double-buffers the inputs/outputs)."""
    return int(2 * td * H * W * itemsize          # mid tile (x2 buffers)
               + 2 * td * H * W * itemsize        # output tile (x2 buffers)
               + 2 * 2 * r * H * W * itemsize     # lo + hi halos (x2 buffers)
               + 2 * 2 * (H * H + W * W) * 4      # band matrices (x2 buffers)
               + td * H * W * 4                   # f32 acc scratch (single)
               + (1 << 20))                       # slack for Mosaic internals


def _vmem_budgets():
    """Generation-aware (tile_budget, vmem_limit_cap): conservative on v7x
    (64 MiB/TC physical VMEM), generous on v5e/v6e (128 MiB)."""
    try:
        cap = int(getattr(pltpu.get_tpu_info(), "vmem_capacity_bytes", 64 << 20))
    except Exception:
        cap = 64 << 20
    if cap > (64 << 20):              # v5e / v6e class (128 MiB VMEM)
        return 40 << 20, 96 << 20
    return 16 << 20, 48 << 20         # v7x class (or unknown -> conservative)


# ----------------------------------------------------------------------------
# Pallas kernel: separable depthwise 3D Gaussian, D-tiled with in-kernel halo
# ----------------------------------------------------------------------------
def _gauss3d_kernel(wd_ref, mid_ref, lo_ref, hi_ref, bh_ref, bw_ref, o_ref,
                    acc_ref, *, TD, K, r, matmul_dtype):
    # wd_ref : SMEM (C*K,) f32         per-channel 1-D taps (D pass)
    # mid_ref: VMEM (TD, H, W)         current D tile of the input
    # lo_ref : VMEM (r, H, W)          r rows just below the tile (clamped at d==0)
    # hi_ref : VMEM (r, H, W)          r rows just above the tile (clamped at last d)
    # bh_ref : VMEM (H, H)             banded matrix, H (sublane) pass, left mult
    # bw_ref : VMEM (W, W)             banded matrix (transposed), W pass, right mult
    # o_ref  : VMEM (TD, H, W)
    # acc_ref: VMEM scratch (TD, H, W) f32 -- H-pass results feeding the batched W pass
    c = pl.program_id(1)
    d = pl.program_id(2)
    nd = pl.num_programs(2)
    H = mid_ref.shape[1]
    W = mid_ref.shape[2]

    # 'same' zero padding: halo contributions vanish at the volume boundary.
    # Folded into the *scalar* tap weights (no full-block multiplies).
    lo_scale = (d > 0).astype(jnp.float32)
    hi_scale = (d < nd - 1).astype(jnp.float32)

    # Hoist the K scalar SMEM reads out of all loops.
    wd = [wd_ref[c * K + kd] for kd in range(K)]
    wd_lo = [w * lo_scale for w in wd]
    wd_hi = [w * hi_scale for w in wd]

    bh = bh_ref[...].astype(matmul_dtype)     # (H, H)
    bw = bw_ref[...].astype(matmul_dtype)     # (W, W)

    def d_and_h_pass_static(dd):
        # D pass: shifted leading-dim reads straight from the input blocks.
        acc = None
        for kd in range(K):
            sd = dd + kd - r
            if sd < 0:                                   # lower halo slice
                term = wd_lo[kd] * lo_ref[r + sd].astype(jnp.float32)
            elif sd >= TD:                               # upper halo slice
                term = wd_hi[kd] * hi_ref[sd - TD].astype(jnp.float32)
            else:                                        # interior of the tile
                term = wd[kd] * mid_ref[sd].astype(jnp.float32)
            acc = term if acc is None else acc + term
        # H pass: (H,H)@(H,W) banded matmul; bh is the MXU weight for every slice.
        acc_ref[dd] = jnp.dot(bh, acc.astype(matmul_dtype),
                              preferred_element_type=jnp.float32)

    def d_and_h_pass_dynamic(dd, carry):
        # Interior slices only: all K taps read the mid block (no halo).
        acc = wd[0] * mid_ref[dd - r].astype(jnp.float32)
        for kd in range(1, K):
            acc = acc + wd[kd] * mid_ref[dd - r + kd].astype(jnp.float32)
        acc_ref[dd] = jnp.dot(bh, acc.astype(matmul_dtype),
                              preferred_element_type=jnp.float32)
        return carry

    b_lo = min(r, TD)              # slices that may touch the lower halo
    b_hi = max(TD - r, b_lo)       # slices that may touch the upper halo
    if b_hi - b_lo < 4:
        # Small tile: fully static unroll (static ifs pick mid/lo/hi per tap).
        for dd in range(TD):
            d_and_h_pass_static(dd)
    else:
        for dd in range(b_lo):
            d_and_h_pass_static(dd)
        lax.fori_loop(b_lo, b_hi, d_and_h_pass_dynamic, 0, unroll=2)
        for dd in range(b_hi, TD):
            d_and_h_pass_static(dd)

    # W pass: ONE batched (TD*H, W) @ (W, W) matmul on the flattened scratch
    # (leading-dim merge only -> free relayout when H % 8 == 0).
    t2d = acc_ref[...].reshape(TD * H, W).astype(matmul_dtype)
    y = jnp.dot(t2d, bw, preferred_element_type=jnp.float32)
    o_ref[...] = y.reshape(TD, H, W).astype(o_ref.dtype)
    # TODO(synk): for H or W >= 256, block-band these matmuls (only the <=3
    # diagonal 128/256-wide block-columns of bh/bw are nonzero).


def gaussian_smoothing_3d(image: jnp.ndarray, taps_1d: np.ndarray,
                          *, d_tile: int | None = None,
                          matmul_dtype=jnp.float32) -> jnp.ndarray:
    """image: (N, C, D, H, W); taps_1d: (C, K) per-channel 1-D Gaussian taps.

    matmul_dtype=jnp.bfloat16 feeds the MXU bf16 operands (2-3x faster band
    matmuls on v6e/v7x) at ~1e-3 accuracy; default f32 keeps 1e-5 accuracy."""
    N, C, D, H, W = image.shape
    taps_1d = np.asarray(taps_1d, np.float32)
    assert taps_1d.shape[0] == C
    K = int(taps_1d.shape[1])
    r = K // 2
    assert r >= 1 and D % r == 0, "depth must be a multiple of the kernel radius"

    tile_budget, vmem_cap = _vmem_budgets()
    itemsize = int(jnp.dtype(image.dtype).itemsize)

    cands = [td for td in range(r, D + 1, r) if D % td == 0]
    if d_tile is None:
        fits = [td for td in cands if _est_vmem_bytes(td, H, W, r, itemsize) <= tile_budget]
        TD = max(fits) if fits else min(cands)
        # Keep >= 2 'parallel' grid steps so both v7x TensorCores get work.
        if N * C * (D // TD) < 2:
            smaller = [td for td in cands if td < TD]
            if smaller:
                TD = max(smaller)
    else:
        TD = d_tile
    assert D % TD == 0 and TD % r == 0, "d_tile must divide D and be a multiple of r"
    nd = D // TD
    blk = TD // r           # mid tile width measured in halo-sized (r-row) blocks

    # Compile-time numpy constants -> small per-channel device arrays.
    # H pass left-multiplies by B; the W pass right-multiplies, so it uses B^T
    # (identical for symmetric Gaussian taps, but kept general on purpose).
    bh_all = jnp.asarray(np.stack([_band_matrix(taps_1d[c], H) for c in range(C)]))
    bw_all = jnp.asarray(np.stack([_band_matrix(taps_1d[c], W).T for c in range(C)]))
    wd_flat = jnp.asarray(taps_1d.reshape(-1))

    vmem_limit = int(min(max(2 * _est_vmem_bytes(TD, H, W, r, itemsize), 32 << 20),
                         vmem_cap))

    def mid_map(n, c, d):
        return (n, c, d, 0, 0)

    def lo_map(n, c, d):
        return (n, c, jnp.maximum(d * blk - 1, 0), 0, 0)

    def hi_map(n, c, d):
        return (n, c, jnp.minimum((d + 1) * blk, D // r - 1), 0, 0)

    kernel = functools.partial(_gauss3d_kernel, TD=TD, K=K, r=r,
                               matmul_dtype=matmul_dtype)
    return pl.pallas_call(
        kernel,
        out_shape=jax.ShapeDtypeStruct((N, C, D, H, W), image.dtype),
        grid_spec=pltpu.PrefetchScalarGridSpec(
            num_scalar_prefetch=0,
            grid=(N, C, nd),
            in_specs=[
                pl.BlockSpec(memory_space=pltpu.SMEM),                    # D-axis taps
                pl.BlockSpec((None, None, TD, H, W), mid_map),            # current tile
                pl.BlockSpec((None, None, r, H, W), lo_map),              # lower halo
                pl.BlockSpec((None, None, r, H, W), hi_map),              # upper halo
                pl.BlockSpec((None, H, H), lambda n, c, d: (c, 0, 0)),    # H band matrix
                pl.BlockSpec((None, W, W), lambda n, c, d: (c, 0, 0)),    # W band matrix
            ],
            out_specs=pl.BlockSpec((None, None, TD, H, W), mid_map),
            scratch_shapes=[pltpu.VMEM((TD, H, W), jnp.float32)],
        ),
        compiler_params=pltpu.CompilerParams(
            dimension_semantics=("parallel", "parallel", "parallel"),
            vmem_limit_bytes=vmem_limit),
    )(wd_flat, image, image, image, bh_all, bw_all)
    # TODO(synk): if production volumes have W < 128 lanes, transpose in the
    # wrapper so a >=128 axis is minor (lane-dense vst); demo shapes are small.


# ----------------------------------------------------------------------------
# Demo / correctness check
# ----------------------------------------------------------------------------
def _reference(x, taps):
    """XLA grouped conv3d == F.conv3d(image, weight, groups=3, padding='same')."""
    C = taps.shape[0]
    w3d = np.einsum('ci,cj,ck->cijk', taps, taps, taps)
    w3d = w3d / w3d.sum(axis=(1, 2, 3), keepdims=True)
    return jax.lax.conv_general_dilated(
        x, jnp.asarray(w3d)[:, None],
        window_strides=(1, 1, 1), padding="SAME",
        dimension_numbers=("NCDHW", "OIDHW", "NCDHW"),
        feature_group_count=C)


if __name__ == "__main__":
    key = jax.random.PRNGKey(0)
    N, C, D, H, W = 2, 3, 8, 16, 16   # GaussianSmoothing3d expects 3 channels
    x = jax.random.normal(key, (N, C, D, H, W), dtype=jnp.float32)

    # Config 1: module defaults (sigma=1, cutoff=1 -> K=3, r=1).
    #   d_tile=4 -> multi-tile D path (interior halos, static loop);
    #   d_tile=None -> auto tile (TD=8) exercising the fori_loop interior path.
    taps1, _ = make_gaussian_kernels_1d((1.0, 1.0, 1.0), (1.0, 1.0, 1.0))
    ref1 = _reference(x, taps1)
    out1a = jax.block_until_ready(gaussian_smoothing_3d(x, taps1, d_tile=4))
    out1b = jax.block_until_ready(gaussian_smoothing_3d(x, taps1))
    np.testing.assert_allclose(np.asarray(out1a), np.asarray(ref1), rtol=1e-5, atol=1e-5)
    np.testing.assert_allclose(np.asarray(out1b), np.asarray(ref1), rtol=1e-5, atol=1e-5)

    # Config 2: per-channel sigmas -> different radii (non-same-size path via
    # zero-padded taps, K=5, r=2).  d_tile=2 is halo-only per tile; d_tile=8 is
    # the single-tile + fori_loop path with K=5.
    taps2, _ = make_gaussian_kernels_1d((1.0, 2.0, 3.0), (0.5, 0.5, 0.5))
    ref2 = _reference(x, taps2)
    out2a = jax.block_until_ready(gaussian_smoothing_3d(x, taps2, d_tile=2))
    out2b = jax.block_until_ready(gaussian_smoothing_3d(x, taps2, d_tile=8))
    np.testing.assert_allclose(np.asarray(out2a), np.asarray(ref2), rtol=1e-5, atol=1e-5)
    np.testing.assert_allclose(np.asarray(out2b), np.asarray(ref2), rtol=1e-5, atol=1e-5)

    print("KERNEL_OK")
</pallas_src>

<mosaic_0001>
module attributes {stable_mosaic.version = 11 : i64} {
  func.func @_gauss3d_kernel(%arg0: i32, %arg1: i32, %arg2: i32, %arg3: memref<9xf32, #tpu.memory_space<smem>>, %arg4: memref<1x1x4x16x16xf32, #tpu.memory_space<vmem>>, %arg5: memref<1x1x1x16x16xf32, #tpu.memory_space<vmem>>, %arg6: memref<1x1x1x16x16xf32, #tpu.memory_space<vmem>>, %arg7: memref<1x16x16xf32, #tpu.memory_space<vmem>>, %arg8: memref<1x16x16xf32, #tpu.memory_space<vmem>>, %arg9: memref<1x1x4x16x16xf32, #tpu.memory_space<vmem>>, %arg10: memref<4x16x16xf32, #tpu.memory_space<vmem>>) attributes {dimension_semantics = [#tpu.dimension_semantics<parallel>, #tpu.dimension_semantics<parallel>, #tpu.dimension_semantics<parallel>], iteration_bounds = array<i64: 2, 3, 2>, scalar_prefetch = 0 : i64, scratch_operands = 1 : i64, tpu.core_type = #tpu.core_type<tc>, window_params = [{transform_indices = @transform_0, window_bounds = array<i64: 9>}, {transform_indices = @transform_1, window_bounds = array<i64: 1, 1, 4, 16, 16>}, {transform_indices = @transform_2, window_bounds = array<i64: 1, 1, 1, 16, 16>}, {transform_indices = @transform_3, window_bounds = array<i64: 1, 1, 1, 16, 16>}, {transform_indices = @transform_4, window_bounds = array<i64: 1, 16, 16>}, {transform_indices = @transform_5, window_bounds = array<i64: 1, 16, 16>}, {transform_indices = @transform_6, window_bounds = array<i64: 1, 1, 4, 16, 16>}]} {
    %c0_i32 = arith.constant 0 : i32
    %0 = arith.cmpi sgt, %arg2, %c0_i32 : i32
    %1 = arith.extui %0 : i1 to i32
    %2 = arith.sitofp %1 : i32 to f32
    %c1_i32 = arith.constant 1 : i32
    %3 = arith.cmpi slt, %arg2, %c1_i32 : i32
    %4 = arith.extui %3 : i1 to i32
    %5 = arith.sitofp %4 : i32 to f32
    %c3_i32 = arith.constant 3 : i32
    %6 = arith.muli %arg1, %c3_i32 : i32
    %c0_i32_0 = arith.constant 0 : i32
    %7 = arith.addi %6, %c0_i32_0 : i32
    %8 = arith.index_cast %7 : i32 to index
    %9 = memref.load %arg3[%8] : memref<9xf32, #tpu.memory_space<smem>>
    %c3_i32_1 = arith.constant 3 : i32
    %10 = arith.muli %arg1, %c3_i32_1 : i32
    %c1_i32_2 = arith.constant 1 : i32
    %11 = arith.addi %10, %c1_i32_2 : i32
    %12 = arith.index_cast %11 : i32 to index
    %13 = memref.load %arg3[%12] : memref<9xf32, #tpu.memory_space<smem>>
    %c3_i32_3 = arith.constant 3 : i32
    %14 = arith.muli %arg1, %c3_i32_3 : i32
    %c2_i32 = arith.constant 2 : i32
    %15 = arith.addi %14, %c2_i32 : i32
    %16 = arith.index_cast %15 : i32 to index
    %17 = memref.load %arg3[%16] : memref<9xf32, #tpu.memory_space<smem>>
    %18 = arith.mulf %9, %2 : f32
    %19 = arith.mulf %17, %5 : f32
    %c0 = arith.constant 0 : index
    %c0_4 = arith.constant 0 : index
    %c0_5 = arith.constant 0 : index
    %20 = vector.load %arg7[%c0, %c0_4, %c0_5] : memref<1x16x16xf32, #tpu.memory_space<vmem>>, vector<1x16x16xf32>
    %21 = vector.shape_cast %20 : vector<1x16x16xf32> to vector<16x16xf32>
    %c0_6 = arith.constant 0 : index
    %c0_7 = arith.constant 0 : index
    %c0_8 = arith.constant 0 : index
    %22 = vector.load %arg8[%c0_6, %c0_7, %c0_8] : memref<1x16x16xf32, #tpu.memory_space<vmem>>, vector<1x16x16xf32>
    %23 = vector.shape_cast %22 : vector<1x16x16xf32> to vector<16x16xf32>
    %c0_9 = arith.constant 0 : index
    %c0_10 = arith.constant 0 : index
    %c0_11 = arith.constant 0 : index
    %c0_12 = arith.constant 0 : index
    %c0_13 = arith.constant 0 : index
    %24 = vector.load %arg5[%c0_9, %c0_10, %c0_11, %c0_12, %c0_13] : memref<1x1x1x16x16xf32, #tpu.memory_space<vmem>>, vector<1x1x1x16x16xf32>
    %25 = vector.shape_cast %24 : vector<1x1x1x16x16xf32> to vector<16x16xf32>
    %26 = vector.broadcast %18 : f32 to vector<16x16xf32>
    %27 = arith.mulf %26, %25 : vector<16x16xf32>
    %c0_14 = arith.constant 0 : index
    %c0_15 = arith.constant 0 : index
    %c0_16 = arith.constant 0 : index
    %c0_17 = arith.constant 0 : index
    %c0_18 = arith.constant 0 : index
    %28 = vector.load %arg4[%c0_14, %c0_15, %c0_16, %c0_17, %c0_18] : memref<1x1x4x16x16xf32, #tpu.memory_space<vmem>>, vector<1x1x1x16x16xf32>
    %29 = vector.shape_cast %28 : vector<1x1x1x16x16xf32> to vector<16x16xf32>
    %30 = vector.broadcast %13 : f32 to vector<16x16xf32>
    %31 = arith.mulf %30, %29 : vector<16x16xf32>
    %32 = arith.addf %27, %31 : vector<16x16xf32>
    %c0_19 = arith.constant 0 : index
    %c0_20 = arith.constant 0 : index
    %c1 = arith.constant 1 : index
    %c0_21 = arith.constant 0 : index
    %c0_22 = arith.constant 0 : index
    %33 = vector.load %arg4[%c0_19, %c0_20, %c1, %c0_21, %c0_22] : memref<1x1x4x16x16xf32, #tpu.memory_space<vmem>>, vector<1x1x1x16x16xf32>
    %34 = vector.shape_cast %33 : vector<1x1x1x16x16xf32> to vector<16x16xf32>
    %35 = vector.broadcast %17 : f32 to vector<16x16xf32>
    %36 = arith.mulf %35, %34 : vector<16x16xf32>
    %37 = arith.addf %32, %36 : vector<16x16xf32>
    %cst = arith.constant dense<0.000000e+00> : vector<16x16xf32>
    %38 = tpu.matmul %21, %37, %cst {dimension_numbers = #tpu.dot_dimension_numbers<[1], [0], [0], [1], [0, 0, 1, 1], [], []>} : vector<16x16xf32>, vector<16x16xf32>, vector<16x16xf32> -> vector<16x16xf32>
    %c0_23 = arith.constant 0 : index
    %c0_24 = arith.constant 0 : index
    %c0_25 = arith.constant 0 : index
    %39 = vector.load %arg10[%c0_23, %c0_24, %c0_25] : memref<4x16x16xf32, #tpu.memory_space<vmem>>, vector<1x16x16xf32>
    %40 = vector.shape_cast %39 : vector<1x16x16xf32> to vector<16x16xf32>
    %41 = vector.shape_cast %38 : vector<16x16xf32> to vector<1x16x16xf32>
    tpu.vector_store %arg10[%c0_23, %c0_24, %c0_25], %41 {strides = array<i32>} : memref<4x16x16xf32, #tpu.memory_space<vmem>>, vector<1x16x16xf32>,
    %c0_26 = arith.constant 0 : index
    %c0_27 = arith.constant 0 : index
    %c0_28 = arith.constant 0 : index
    %c0_29 = arith.constant 0 : index
    %c0_30 = arith.constant 0 : index
    %42 = vector.load %arg4[%c0_26, %c0_27, %c0_28, %c0_29, %c0_30] : memref<1x1x4x16x16xf32, #tpu.memory_space<vmem>>, vector<1x1x1x16x16xf32>
    %43 = vector.shape_cast %42 : vector<1x1x1x16x16xf32> to vector<16x16xf32>
    %44 = vector.broadcast %9 : f32 to vector<16x16xf32>
    %45 = arith.mulf %44, %43 : vector<16x16xf32>
    %c0_31 = arith.constant 0 : index
    %c0_32 = arith.constant 0 : index
    %c1_33 = arith.constant 1 : index
    %c0_34 = arith.constant 0 : index
    %c0_35 = arith.constant 0 : index
    %46 = vector.load %arg4[%c0_31, %c0_32, %c1_33, %c0_34, %c0_35] : memref<1x1x4x16x16xf32, #tpu.memory_space<vmem>>, vector<1x1x1x16x16xf32>
    %47 = vector.shape_cast %46 : vector<1x1x1x16x16xf32> to vector<16x16xf32>
    %48 = vector.broadcast %13 : f32 to vector<16x16xf32>
    %49 = arith.mulf %48, %47 : vector<16x16xf32>
    %50 = arith.addf %45, %49 : vector<16x16xf32>
    %c0_36 = arith.constant 0 : index
    %c0_37 = arith.constant 0 : index
    %c2 = arith.constant 2 : index
    %c0_38 = arith.constant 0 : index
    %c0_39 = arith.constant 0 : index
    %51 = vector.load %arg4[%c0_36, %c0_37, %c2, %c0_38, %c0_39] : memref<1x1x4x16x16xf32, #tpu.memory_space<vmem>>, vector<1x1x1x16x16xf32>
    %52 = vector.shape_cast %51 : vector<1x1x1x16x16xf32> to vector<16x16xf32>
    %53 = vector.broadcast %17 : f32 to vector<16x16xf32>
    %54 = arith.mulf %53, %52 : vector<16x16xf32>
    %55 = arith.addf %50, %54 : vector<16x16xf32>
    %cst_40 = arith.constant dense<0.000000e+00> : vector<16x16xf32>
    %56 = tpu.matmul %21, %55, %cst_40 {dimension_numbers = #tpu.dot_dimension_numbers<[1], [0], [0], [1], [0, 0, 1, 1], [], []>} : vector<16x16xf32>, vector<16x16xf32>, vector<16x16xf32> -> vector<16x16xf32>
    %c1_41 = arith.constant 1 : index
    %c0_42 = arith.constant 0 : index
    %c0_43 = arith.constant 0 : index
    %57 = vector.load %arg10[%c1_41, %c0_42, %c0_43] : memref<4x16x16xf32, #tpu.memory_space<vmem>>, vector<1x16x16xf32>
    %58 = vector.shape_cast %57 : vector<1x16x16xf32> to vector<16x16xf32>
    %59 = vector.shape_cast %56 : vector<16x16xf32> to vector<1x16x16xf32>
    tpu.vector_store %arg10[%c1_41, %c0_42, %c0_43], %59 {strides = array<i32>} : memref<4x16x16xf32, #tpu.memory_space<vmem>>, vector<1x16x16xf32>,
    %c0_44 = arith.constant 0 : index
    %c0_45 = arith.constant 0 : index
    %c1_46 = arith.constant 1 : index
    %c0_47 = arith.constant 0 : index
    %c0_48 = arith.constant 0 : index
    %60 = vector.load %arg4[%c0_44, %c0_45, %c1_46, %c0_47, %c0_48] : memref<1x1x4x16x16xf32, #tpu.memory_space<vmem>>, vector<1x1x1x16x16xf32>
    %61 = vector.shape_cast %60 : vector<1x1x1x16x16xf32> to vector<16x16xf32>
    %62 = vector.broadcast %9 : f32 to vector<16x16xf32>
    %63 = arith.mulf %62, %61 : vector<16x16xf32>
    %c0_49 = arith.constant 0 : index
    %c0_50 = arith.constant 0 : index
    %c2_51 = arith.constant 2 : index
    %c0_52 = arith.constant 0 : index
    %c0_53 = arith.constant 0 : index
    %64 = vector.load %arg4[%c0_49, %c0_50, %c2_51, %c0_52, %c0_53] : memref<1x1x4x16x16xf32, #tpu.memory_space<vmem>>, vector<1x1x1x16x16xf32>
    %65 = vector.shape_cast %64 : vector<1x1x1x16x16xf32> to vector<16x16xf32>
    %66 = vector.broadcast %13 : f32 to vector<16x16xf32>
    %67 = arith.mulf %66, %65 : vector<16x16xf32>
    %68 = arith.addf %63, %67 : vector<16x16xf32>
    %c0_54 = arith.constant 0 : index
    %c0_55 = arith.constant 0 : index
    %c3 = arith.constant 3 : index
    %c0_56 = arith.constant 0 : index
    %c0_57 = arith.constant 0 : index
    %69 = vector.load %arg4[%c0_54, %c0_55, %c3, %c0_56, %c0_57] : memref<1x1x4x16x16xf32, #tpu.memory_space<vmem>>, vector<1x1x1x16x16xf32>
    %70 = vector.shape_cast %69 : vector<1x1x1x16x16xf32> to vector<16x16xf32>
    %71 = vector.broadcast %17 : f32 to vector<16x16xf32>
    %72 = arith.mulf %71, %70 : vector<16x16xf32>
    %73 = arith.addf %68, %72 : vector<16x16xf32>
    %cst_58 = arith.constant dense<0.000000e+00> : vector<16x16xf32>
    %74 = tpu.matmul %21, %73, %cst_58 {dimension_numbers = #tpu.dot_dimension_numbers<[1], [0], [0], [1], [0, 0, 1, 1], [], []>} : vector<16x16xf32>, vector<16x16xf32>, vector<16x16xf32> -> vector<16x16xf32>
    %c2_59 = arith.constant 2 : index
    %c0_60 = arith.constant 0 : index
    %c0_61 = arith.constant 0 : index
    %75 = vector.load %arg10[%c2_59, %c0_60, %c0_61] : memref<4x16x16xf32, #tpu.memory_space<vmem>>, vector<1x16x16xf32>
    %76 = vector.shape_cast %75 : vector<1x16x16xf32> to vector<16x16xf32>
    %77 = vector.shape_cast %74 : vector<16x16xf32> to vector<1x16x16xf32>
    tpu.vector_store %arg10[%c2_59, %c0_60, %c0_61], %77 {strides = array<i32>} : memref<4x16x16xf32, #tpu.memory_space<vmem>>, vector<1x16x16xf32>,
    %c0_62 = arith.constant 0 : index
    %c0_63 = arith.constant 0 : index
    %c2_64 = arith.constant 2 : index
    %c0_65 = arith.constant 0 : index
    %c0_66 = arith.constant 0 : index
    %78 = vector.load %arg4[%c0_62, %c0_63, %c2_64, %c0_65, %c0_66] : memref<1x1x4x16x16xf32, #tpu.memory_space<vmem>>, vector<1x1x1x16x16xf32>
    %79 = vector.shape_cast %78 : vector<1x1x1x16x16xf32> to vector<16x16xf32>
    %80 = vector.broadcast %9 : f32 to vector<16x16xf32>
    %81 = arith.mulf %80, %79 : vector<16x16xf32>
    %c0_67 = arith.constant 0 : index
    %c0_68 = arith.constant 0 : index
    %c3_69 = arith.constant 3 : index
    %c0_70 = arith.constant 0 : index
    %c0_71 = arith.constant 0 : index
    %82 = vector.load %arg4[%c0_67, %c0_68, %c3_69, %c0_70, %c0_71] : memref<1x1x4x16x16xf32, #tpu.memory_space<vmem>>, vector<1x1x1x16x16xf32>
    %83 = vector.shape_cast %82 : vector<1x1x1x16x16xf32> to vector<16x16xf32>
    %84 = vector.broadcast %13 : f32 to vector<16x16xf32>
    %85 = arith.mulf %84, %83 : vector<16x16xf32>
    %86 = arith.addf %81, %85 : vector<16x16xf32>
    %c0_72 = arith.constant 0 : index
    %c0_73 = arith.constant 0 : index
    %c0_74 = arith.constant 0 : index
    %c0_75 = arith.constant 0 : index
    %c0_76 = arith.constant 0 : index
    %87 = vector.load %arg6[%c0_72, %c0_73, %c0_74, %c0_75, %c0_76] : memref<1x1x1x16x16xf32, #tpu.memory_space<vmem>>, vector<1x1x1x16x16xf32>
    %88 = vector.shape_cast %87 : vector<1x1x1x16x16xf32> to vector<16x16xf32>
    %89 = vector.broadcast %19 : f32 to vector<16x16xf32>
    %90 = arith.mulf %89, %88 : vector<16x16xf32>
    %91 = arith.addf %86, %90 : vector<16x16xf32>
    %cst_77 = arith.constant dense<0.000000e+00> : vector<16x16xf32>
    %92 = tpu.matmul %21, %91, %cst_77 {dimension_numbers = #tpu.dot_dimension_numbers<[1], [0], [0], [1], [0, 0, 1, 1], [], []>} : vector<16x16xf32>, vector<16x16xf32>, vector<16x16xf32> -> vector<16x16xf32>
    %c3_78 = arith.constant 3 : index
    %c0_79 = arith.constant 0 : index
    %c0_80 = arith.constant 0 : index
    %93 = vector.load %arg10[%c3_78, %c0_79, %c0_80] : memref<4x16x16xf32, #tpu.memory_space<vmem>>, vector<1x16x16xf32>
    %94 = vector.shape_cast %93 : vector<1x16x16xf32> to vector<16x16xf32>
    %95 = vector.shape_cast %92 : vector<16x16xf32> to vector<1x16x16xf32>
    tpu.vector_store %arg10[%c3_78, %c0_79, %c0_80], %95 {strides = array<i32>} : memref<4x16x16xf32, #tpu.memory_space<vmem>>, vector<1x16x16xf32>,
    %c0_81 = arith.constant 0 : index
    %c0_82 = arith.constant 0 : index
    %c0_83 = arith.constant 0 : index
    %96 = vector.load %arg10[%c0_81, %c0_82, %c0_83] : memref<4x16x16xf32, #tpu.memory_space<vmem>>, vector<4x16x16xf32>
    %97 = vector.shape_cast %96 : vector<4x16x16xf32> to vector<64x16xf32>
    %cst_84 = arith.constant dense<0.000000e+00> : vector<64x16xf32>
    %98 = tpu.matmul %97, %23, %cst_84 {dimension_numbers = #tpu.dot_dimension_numbers<[1], [0], [0], [1], [0, 0, 1, 1], [], []>} : vector<64x16xf32>, vector<16x16xf32>, vector<64x16xf32> -> vector<64x16xf32>
    %99 = vector.shape_cast %98 : vector<64x16xf32> to vector<4x16x16xf32>
    %c0_85 = arith.constant 0 : index
    %c0_86 = arith.constant 0 : index
    %c0_87 = arith.constant 0 : index
    %c0_88 = arith.constant 0 : index
    %c0_89 = arith.constant 0 : index
    %100 = vector.load %arg9[%c0_85, %c0_86, %c0_87, %c0_88, %c0_89] : memref<1x1x4x16x16xf32, #tpu.memory_space<vmem>>, vector<1x1x4x16x16xf32>
    %101 = vector.shape_cast %100 : vector<1x1x4x16x16xf32> to vector<4x16x16xf32>
    %102 = vector.shape_cast %99 : vector<4x16x16xf32> to vector<1x1x4x16x16xf32>
    tpu.vector_store %arg9[%c0_85, %c0_86, %c0_87, %c0_88, %c0_89], %102 {strides = array<i32>} : memref<1x1x4x16x16xf32, #tpu.memory_space<vmem>>, vector<1x1x4x16x16xf32>,
    return
  }
  func.func @transform_0(%arg0: i32, %arg1: i32, %arg2: i32) -> i32 {
    %c0_i32 = arith.constant 0 : i32
    %c0_i32_0 = arith.constant 0 : i32
    return %c0_i32 : i32
  }
  func.func @transform_1(%arg0: i32, %arg1: i32, %arg2: i32) -> (i32, i32, i32, i32, i32) {
    %c0_i32 = arith.constant 0 : i32
    %c0_i32_0 = arith.constant 0 : i32
    %c0_i32_1 = arith.constant 0 : i32
    return %arg0, %arg1, %arg2, %c0_i32, %c0_i32_0 : i32, i32, i32, i32, i32
  }
  func.func @transform_2(%arg0: i32, %arg1: i32, %arg2: i32) -> (i32, i32, i32, i32, i32) {
    %c4_i32 = arith.constant 4 : i32
    %0 = arith.muli %arg2, %c4_i32 : i32
    %c1_i32 = arith.constant 1 : i32
    %1 = arith.subi %0, %c1_i32 : i32
    %c0_i32 = arith.constant 0 : i32
    %2 = arith.maxsi %1, %c0_i32 : i32
    %c0_i32_0 = arith.constant 0 : i32
    %c0_i32_1 = arith.constant 0 : i32
    %c0_i32_2 = arith.constant 0 : i32
    return %arg0, %arg1, %2, %c0_i32_0, %c0_i32_1 : i32, i32, i32, i32, i32
  }
  func.func @transform_3(%arg0: i32, %arg1: i32, %arg2: i32) -> (i32, i32, i32, i32, i32) {
    %c1_i32 = arith.constant 1 : i32
    %0 = arith.addi %arg2, %c1_i32 : i32
    %c4_i32 = arith.constant 4 : i32
    %1 = arith.muli %0, %c4_i32 : i32
    %c7_i32 = arith.constant 7 : i32
    %2 = arith.minsi %1, %c7_i32 : i32
    %c0_i32 = arith.constant 0 : i32
    %c0_i32_0 = arith.constant 0 : i32
    %c0_i32_1 = arith.constant 0 : i32
    return %arg0, %arg1, %2, %c0_i32, %c0_i32_0 : i32, i32, i32, i32, i32
  }
  func.func @transform_4(%arg0: i32, %arg1: i32, %arg2: i32) -> (i32, i32, i32) {
    %c0_i32 = arith.constant 0 : i32
    %c0_i32_0 = arith.constant 0 : i32
    %c0_i32_1 = arith.constant 0 : i32
    return %arg1, %c0_i32, %c0_i32_0 : i32, i32, i32
  }
  func.func @transform_5(%arg0: i32, %arg1: i32, %arg2: i32) -> (i32, i32, i32) {
    %c0_i32 = arith.constant 0 : i32
    %c0_i32_0 = arith.constant 0 : i32
    %c0_i32_1 = arith.constant 0 : i32
    return %arg1, %c0_i32, %c0_i32_0 : i32, i32, i32
  }
  func.func @transform_6(%arg0: i32, %arg1: i32, %arg2: i32) -> (i32, i32, i32, i32, i32) {
    %c0_i32 = arith.constant 0 : i32
    %c0_i32_0 = arith.constant 0 : i32
    %c0_i32_1 = arith.constant 0 : i32
    return %arg0, %arg1, %arg2, %c0_i32, %c0_i32_0 : i32, i32, i32, i32, i32
  }
}

</mosaic_0001>

<bundles_post_ra>
// kernel: tpu_custom_call.1
= control target key start
LH: loop header
LB: loop body
LE: loop exit
PB: predicated region body
PF: predicated region fallthrough
CT: control target
= control target key end

     0   :  { %s2820_s0 = inlined_call_operand.hbm [shape: f32[9], index: 0, kind: input, shape index: {}]   ;;  %s2821_s1 = inlined_call_operand.hbm [shape: f32[2,3,8,16,16], index: 1, kind: input, shape index: {}]   ;;  %s2822_s2 = inlined_call_operand.hbm [shape: f32[2,3,8,16,16], index: 2, kind: input, shape index: {}]   ;;  %s2823_s3 = inlined_call_operand.hbm [shape: f32[2,3,8,16,16], index: 3, kind: input, shape index: {}]   ;;  %s2824_s4 = inlined_call_operand.hbm [shape: f32[3,16,16], index: 4, kind: input, shape index: {}]   ;;  %s2825_s5 = inlined_call_operand.hbm [shape: f32[3,16,16], index: 5, kind: input, shape index: {}]   ;;  %s2826_s6 = inlined_call_operand.hbm [shape: f32[2,3,8,16,16], index: 6, kind: output, shape index: {}]  }
   0x1   :  { %2875 = sst [smem:[#allocation50_spill]] %s2820_s0 }
   0x2   :  { %2876 = sst [smem:[#allocation51_spill]] %s2821_s1 }
   0x3   :  { %2877 = sst [smem:[#allocation52_spill]] %s2822_s2 }
   0x4   :  { %2878 = sst [smem:[#allocation53_spill]] %s2823_s3 }
   0x5   :  { %2879 = sst [smem:[#allocation54_spill]] %s2824_s4 }
   0x6   :  { %2880 = sst [smem:[#allocation55_spill]] %s2826_s6 }
   0x7   :  { %11 = vsyncpa [#allocation6], 0 }
   0x8   :  { %12 = vsyncpa [#allocation4], 0 }
   0x9   :  { %14 = vsyncpa [#allocation4 + $0x1], 0 }
   0xa   :  { %15 = vsyncpa [#allocation9], 0 }
   0xb   :  { %17 = vsyncpa [#allocation9 + $0x1], 0 }
   0xc   :  { %18 = vsyncpa [#allocation12], 0 }
   0xd   :  { %20 = vsyncpa [#allocation12 + $0x1], 0 }
   0xe   :  { %21 = vsyncpa [#allocation5], 0 }
   0xf   :  { %23 = vsyncpa [#allocation5 + $0x1], 0  ;;  %s2098_s21 = smov 0   ;;  %s2100_s22 = smov 0  }
  0x10   :  { %s2102_s23 = smov 0   ;;  %s2104_s24 = smov 0  }
  0x11   :  { %s2106_s25 = smov 0   ;;  %s2108_s26 = smov 0  }
  0x12   :  { %s2110_s27 = smov 0   ;;  %s2112_s28 = smov 0  }
  0x13   :  { %s2114_s29 = smov 0   ;;  %s2116_s30 = smov 0  }
  0x14   :  { %s2118_s7 = smov 0   ;;  %s2120_s8 = smov 0  }
  0x15   :  { %s2122_s9 = smov 0   ;;  %s2124_s10 = smov 0  }
  0x16   :  { %s2126_s11 = smov 0   ;;  %s2128_s12 = smov 0  }
  0x17   :  { %s2130_s13 = smov 0   ;;  %s2132_s14 = smov 0  }
  0x18   :  { %s2134_s15 = smov 0  }
  0x19 LB: > { %2881 = sst [smem:[#allocation21_spill]] %s1982_s22  ;;  %s41_s16 = sadd.s32 1, %s2038_s12  ;;  %s2050_s15 = sphi %s2134_s15, %s29_s15   ;;  %s2046_s14 = sphi %s2132_s14, %s2999_s14   ;;  %s2042_s13 = sphi %s2130_s13, %s2994_s13   ;;  %s2038_s12 = sphi %s2128_s12, %s2993_s12   ;;  %s2034_s11 = sphi %s2126_s11, %s2992_s11   ;;  %s2030_s10 = sphi %s2124_s10, %s2998_s10   ;;  %s2026_s9 = sphi %s2122_s9, %s2990_s9   ;;  %s2022_s8 = sphi %s2120_s8, %s2989_s8   ;;  %s2018_s7 = sphi %s2118_s7, %s2988_s7   ;;  %s2014_s30 = sphi %s2116_s30, %s2987_s30   ;;  %s2010_s29 = sphi %s2114_s29, %s2986_s29   ;;  %s2006_s28 = sphi %s2112_s28, %s2985_s28   ;;  %s2002_s27 = sphi %s2110_s27, %s2984_s27   ;;  %s1998_s26 = sphi %s2108_s26, %s2997_s26   ;;  %s1994_s25 = sphi %s2106_s25, %s2983_s25   ;;  %s1990_s24 = sphi %s2104_s24, %s2982_s24   ;;  %s1986_s23 = sphi %s2102_s23, %s2981_s23   ;;  %s1982_s22 = sphi %s2100_s22, %s2980_s22   ;;  %s1978_s21 = sphi %s2098_s21, %s2979_s21  }
  0x1a   : > { %2882 = sst [smem:[#allocation22_spill]] %s1986_s23  ;;  %s44_s17 = sadd.s32 1, %s2042_s13 }
  0x1b   : > { %2883 = sst [smem:[#allocation23_spill]] %s1990_s24  ;;  %p42_p0 = scmp.ge.s32.totalorder %s41_s16, 2 }
  0x1c   : > { %2884 = sst [smem:[#allocation24_spill]] %s1994_s25  ;;  %s48_s18 = sadd.s32 1, %s2046_s14 }
  0x1d   : > { %2885 = sst [smem:[#allocation25_spill]] %s1998_s26  ;;  %p2847_p1 = scmp.eq.s32.totalorder %s2050_s15, 0 }
  0x1e   : > { %2886 = sst [smem:[#allocation26_spill]] %s2006_s28  ;;  %s2831_s19 = sshll.u32 %s2038_s12, 2 }
  0x1f   : > { %2887 = sst [smem:[#allocation27_spill]] %s2010_s29  ;;  %s3001_s16 = smov (%p42_p0, %s41_s16), 0 }
  0x20   : > { %2888 = sst [smem:[#allocation28_spill]] %s2014_s30  ;;  %s3003_s17 = smov (!%p42_p0, %s44_s17), %s2042_s13 }
  0x21   : > { %2889 = sst [smem:[#allocation29_spill]] %s2018_s7  ;;  %s76_s20 = ssub.s32 %s2038_s12, %s3001_s16 }
  0x22   : > { %2890 = sst [smem:[#allocation30_spill]] %s2022_s8  ;;  %s1301_s6 = sadd.s32 4294967295, %s2831_s19 }
  0x23   : > { %2891 = sst [smem:[#allocation31_spill]] %s2026_s9  ;;  %p46_p2 = scmp.ge.s32.totalorder %s3003_s17, 3 }
  0x24   : > { %2892 = sst [smem:[#allocation32_spill]] %s2030_s10  ;;  %p105_p3 = scmp.gt.s32.totalorder %s1301_s6, 0 }
  0x25   : > { %2893 = sst [smem:[#allocation33_spill]] %s2034_s11  ;;  %s1302_s11 = sshll.u32 %s3001_s16, 2 }
  0x26   : > { %2894 = sst [smem:[#allocation34_spill]] %s2038_s12  ;;  %s118_s10 = sadd.s32 1, %s2010_s29 }
  0x27   : > { %2895 = sst [smem:[#allocation35_spill]] %s2042_s13  ;;  %s3005_s17 = smov (%p46_p2, %s3003_s17), 0 }
  0x28   : > { %2896 = sst [smem:[#allocation36_spill]] %s2046_s14  ;;  %s3007_s18 = smov (!%p46_p2, %s48_s18), %s2046_s14 }
  0x29   : > { %2897 = sst [smem:[#allocation37_spill]] %s3001_s16  ;;  %s2212_s9 = ssub.s32 %s2042_s13, %s3005_s17 }
  0x2a   : > { %2898 = sst [smem:[#allocation38_spill]] %s3005_s17  ;;  %s1303_s3 = sadd.s32 4294967295, %s1302_s11 }
  0x2b   : > { %p50_p4 = scmp.ge.s32.totalorder %s3007_s18, 2  ;;  %p109_p5 = scmp.gt.s32.totalorder %s1303_s3, 0 }
  0x2c   : > { %s3009_s6 = smov (!%p105_p3, %s1301_s6), 0  ;;  %p125_p6 = scmp.ne.s32.totalorder %s2010_s29, %s2006_s28 }
  0x2d   : > { %s3011_s18 = smov (%p50_p4, %s3007_s18), 0  ;;  %s3013_s3 = smov (!%p109_p5, %s1303_s3), 0 }
  0x2e   : > { %2899 = sst [smem:[#allocation39_spill]] %s3011_s18  ;;  %s73_s19 = ssub.s32 %s2046_s14, %s3011_s18 }
  0x2f   : > { %s2221_s17 = sor.u32 %s2212_s9, %s73_s19  ;;  %s114_s16 = ssub.s32 %s3009_s6, %s3013_s3 }
  0x30   : > { %2900 = sst [smem:[#allocation40_spill]] %s2221_s17  ;;  %s2224_s24 = sor.u32 %s76_s20, %s2221_s17 }
  0x31   : > { %2901 = sst [smem:[#allocation41_spill]] %s2224_s24  ;;  %s115_s25 = sor.u32 %s114_s16, %s2221_s17 }
  0x32   : > { %p116_p8 = scmp.eq.s32.totalorder %s115_s25, 0  ;;  %p2230_p9 = por %p125_p6, %p2847_p1 }
  0x33   : > { %s2904_s26 = sshll.u32 %s2038_s12, 2  ;;  %s2243_s3 = sadd.s32 4, %s1302_s11 }
  0x34   : > { %s2237_s19 = scalar_select %p116_p8, %s2010_s29, %s118_s10  }
  0x35   : > { %s2241_s1 = sadd.s32 4, %s2904_s26  ;;  %2906 = sst [smem:[#allocation44_spill]] %s2243_s3 }
  0x36   : > { %2903 = sst [smem:[#allocation42_spill]] %s2237_s19  ;;  %p180_p13 = scmp.eq.s32.totalorder %s2212_s9, 0 }
  0x37   : > { %2905 = sst [smem:[#allocation43_spill]] %s2241_s1  ;;  %p2846_p0 = scmp.lt.s32.totalorder %s2050_s15, 12 }
  0x38   : > { %s2250_s25 = sshll.u32 %s2042_s13, 4  ;;  %s2253_s16 = smul.u32 48, %s2046_s14 }
  0x39   : > { %s310_s10 = sand.u32 1, %s2050_s15   ;;  %s312_s26 = sand.u32 1, %s2010_s29  }
  0x3a   : > { %s1314_s20 = sshll.u32 %s312_s26, 4  ;;  %s1317_s19 = sshll.u32 %s3009_s6, 1 }
  0x3b   : > { %s324_s11 = sadd.s32 %s1317_s19, %s2250_s25  ;;  %s314_s12 = scalar_lea.vmem [#allocation8], %s1314_s20 }
  0x3c   : > { %s326_s17 = sadd.s32 %s2253_s16, %s324_s11  ;;  %s329_s1 = sshll.u32 %s314_s12, 4  ;;  %s2259_s1 = int_to_ptr.vmem [resolvable:$true] %s329_s1 }
  0x3d   : > { %s1319_s3 = sshll.u32 %s326_s17, 7  ;;  %s2907_s2 = sld [smem:[#allocation52_spill]] }
  0x3e   : > { %p2270_p2 = pnand %p2846_p0, %p2230_p9  ;;  %s2276_s12 = scalar_lea.sflag [#allocation9], %s310_s10 }
  0x40   : > { %p1687_p4 = pneg %p2270_p2 }
  0x43   : > { %s2264_s24 = scalar_lea.hbm %s2907_s2, %s1319_s3  ;;  %s1690_s18 = scalar_lea.hbm %s2907_s2, 12288 }
  0x44   : > { %s1685_s17 = scalar_lea.hbm %s2264_s24, 256  ;;  %p1691_p8 = scmp.lt.u32.totalorder %s2264_s24, %s2907_s2 }
  0x45   : > { %p1686_p3 = scmp.ne.s32.totalorder %s2264_s24, %s1685_s17  ;;  %p1692_p9 = scmp.lt.u32.totalorder %s1690_s18, %s1685_s17 }
  0x46   : > { %p1694_p11 = scmp.lt.u32.totalorder %s1685_s17, %s2264_s24 }
  0x47   : > { %p1688_p5 = pnand %p1687_p4, %p1686_p3  ;;  %p1693_p12 = por %p1692_p9, %p1691_p8 }
  0x49   : > { %p1689_p6 = pneg %p1688_p5  ;;  %p1695_p7 = por %p1694_p11, %p1693_p12 }
  0x4b   : > { %p1696_p10 = pnand %p1695_p7, %p1689_p6 }
  0x4d   : > { %1699 = shalt.err (!%p1696_p10)
}
  0x4e   : > { %s1700_s26 = scalar_lea.vmem %s2259_s1, 256  ;;  %s2052_s20 = smov [#allocation8]  }
  0x4f   : > { %p1701_p3 = scmp.ne.s32.totalorder %s2259_s1, %s1700_s26  ;;  %s1705_s11 = sshll.u32 %s2052_s20, 4  ;;  %s1706_s11 = int_to_ptr.vmem [resolvable:$false] %s1705_s11 }
  0x50   : > { %s1707_s30 = scalar_lea.vmem %s1706_s11, 512  ;;  %p1708_p1 = scmp.lt.s32.totalorder %s2259_s1, %s1706_s11 }
  0x51   : > { %p1703_p5 = pnand %p1701_p3, %p1687_p4  ;;  %p1709_p8 = scmp.lt.s32.totalorder %s1707_s30, %s1700_s26 }
  0x53   : > { %p1704_p0 = pneg %p1703_p5  ;;  %p1710_p9 = por %p1709_p8, %p1708_p1 }
  0x55   : > { %p1711_p11 = pnand %p1710_p9, %p1704_p0 }
  0x57   : > { %1714 = shalt.err (!%p1711_p11)
}
  0x58   : > { %s2848_s17 = smov 128   ;;  %s2850_s7 = smov 8  }
  0x59   : > { %1510 = dma.hbm_to_vmem [thread:$0]  (!%p2270_p2), %s2264_s24, 256, %s2259_s1, %s2276_s12, %s2848_s17, %s2848_s17, %s2850_s7  }
  0x5a   : > { %s182_s18 = sadd.s32 1, %s1986_s23  ;;  %p189_p1 = scmp.ne.s32.totalorder %s1986_s23, %s1982_s22 }
  0x5b   : > { %s2311_s19 = scalar_select %p180_p13, %s1986_s23, %s182_s18  }
  0x5c   : > { %p195_p7 = scmp.ne.s32.totalorder %s1982_s22, %s1978_s21  ;;  %s370_s3 = sand.u32 1, %s1986_s23  }
  0x5d   : > { %2909 = sst [smem:[#allocation45_spill]] %s2311_s19  ;;  %p2910_p10 = scmp.eq.s32.totalorder %s2050_s15, 0 }
  0x5e   : > { %s1325_s26 = sshll.u32 %s370_s3, 4  ;;  %s1385_s20 = sshll.u32 %s2042_s13, 8 }
  0x5f   : > { %p191_p12 = por %p189_p1, %p2910_p10  ;;  %s2911_s4 = sld [smem:[#allocation54_spill]] }
  0x60   : > { %s372_s1 = scalar_lea.vmem [#allocation11], %s1325_s26  ;;  %p2912_p13 = scmp.lt.s32.totalorder %s2050_s15, 12 }
  0x61   : > { %s379_s24 = sshll.u32 %s372_s1, 4  ;;  %s2337_s11 = scalar_lea.hbm %s2825_s5, %s1385_s20  ;;  %s2326_s24 = int_to_ptr.vmem [resolvable:$true] %s379_s24 }
  0x62   : > { %p2330_p0 = pnand %p2912_p13, %p191_p12  ;;  %s393_s30 = scalar_lea.vmem [#allocation13], %s1325_s26 }
  0x63   : > { %s2339_s17 = sshll.u32 %s393_s30, 4  ;;  %s2343_s1 = scalar_lea.sflag [#allocation12], %s310_s10  ;;  %s2375_s17 = int_to_ptr.vmem [resolvable:$true] %s2339_s17 }
  0x64   : > { %p2854_p4 = pneg %p2330_p0 }
  0x65   : > { %s2324_s6 = scalar_lea.hbm %s2911_s4, %s1385_s20  ;;  %s1720_s3 = scalar_lea.hbm %s2911_s4, 768 }
  0x66   : > { %s1715_s7 = scalar_lea.hbm %s2324_s6, 256  ;;  %p1721_p5 = scmp.lt.u32.totalorder %s2324_s6, %s2911_s4 }
  0x67   : > { %p1716_p2 = scmp.ne.s32.totalorder %s2324_s6, %s1715_s7  ;;  %p1722_p8 = scmp.lt.u32.totalorder %s1720_s3, %s1715_s7 }
  0x68   : > { %p1724_p11 = scmp.lt.u32.totalorder %s1715_s7, %s2324_s6 }
  0x69   : > { %p1718_p6 = pnand %p2854_p4, %p1716_p2  ;;  %p1723_p9 = por %p1722_p8, %p1721_p5 }
  0x6b   : > { %p1719_p3 = pneg %p1718_p6  ;;  %p1725_p1 = por %p1724_p11, %p1723_p9 }
  0x6d   : > { %p1726_p10 = pnand %p1725_p1, %p1719_p3 }
  0x6f   : > { %1729 = shalt.err (!%p1726_p10)
}
  0x70   : > { %s1730_s10 = scalar_lea.vmem %s2326_s24, 256  ;;  %s2055_s2 = smov [#allocation11]  }
  0x71   : > { %p1731_p12 = scmp.ne.s32.totalorder %s2326_s24, %s1730_s10  ;;  %s1735_s26 = sshll.u32 %s2055_s2, 4  ;;  %s1736_s26 = int_to_ptr.vmem [resolvable:$false] %s1735_s26 }
  0x72   : > { %s1737_s14 = scalar_lea.vmem %s1736_s26, 512  ;;  %p1738_p6 = scmp.lt.s32.totalorder %s2326_s24, %s1736_s26 }
  0x73   : > { %p1733_p13 = pnand %p1731_p12, %p2854_p4  ;;  %p1739_p5 = scmp.lt.s32.totalorder %s1737_s14, %s1730_s10 }
  0x75   : > { %p1734_p2 = pneg %p1733_p13  ;;  %p1740_p8 = por %p1739_p5, %p1738_p6 }
  0x77   : > { %p1741_p9 = pnand %p1740_p8, %p1734_p2 }
  0x79   : > { %1744 = shalt.err (!%p1741_p9)
}
  0x7a   : > { %s2914_s7 = smov 8   ;;  %s2915_s30 = smov 128  }
  0x7b   : > { %1516 = dma.hbm_to_vmem [thread:$0]  (!%p2330_p0), %s2324_s6, 256, %s2326_s24, %s2343_s1, %s2915_s30, %s2915_s30, %s2914_s7  }
  0x7c   : > { %s2378_s18 = sadd.s32 4294967295, %s2050_s15   ;;  %p1306_p1 = scmp.ge.s32.totalorder %s2050_s15, 1 }
  0x7d   : > { %p2864_p3 = scmp.eq.s32.totalorder %s2378_s18, 0  ;;  %p249_p11 = scmp.eq.s32.totalorder %s2378_s18, 11 }
  0x7e   : > { %p262_p10 = scmp.lt.s32.totalorder %s2050_s15, 13  ;;  %p2916_p12 = scmp.ne.s32.totalorder %s2006_s28, %s2002_s27 }
  0x7f   : > { %p2398_p2 = por %p195_p7, %p2864_p3  ;;  %s1299_s27 = sadd.s32 4294967294, %s2050_s15  }
  0x80   : > { %p2389_p13 = por %p2916_p12, %p2864_p3  ;;  %p2402_p6 = pnand %p1306_p1, %p262_p10 }
  0x81   : > { %s2919_s6 = scalar_select %p2398_p2, 1, 0 }
  0x82   : > { %s2917_s3 = scalar_select %p2389_p13, 1, 0 }
  0x83   : > { %2920 = sst [smem:[#allocation47_spill]] %s2919_s6  ;;  %p1500_p5 = pneg %p2402_p6 }
  0x84   : > { %2918 = sst [smem:[#allocation46_spill]] %s2917_s3  ;;  %s80_s20 = sadd.s32 1, %s2022_s8 }
  0x85   : > { %s2921_s24 = scalar_select %p2402_p6, 1, 0 }
  0x86   : > { %p1501_p8 = pnand %p1500_p5, %p2864_p3  ;;  %s2922_s0 = sld [smem:[#allocation50_spill]] }
  0x88   : > { %p1747_p9 = pneg %p1501_p8 }
  0x8c   : > { %s1745_s26 = scalar_lea.hbm %s2922_s0, 16 }
  0x8d   : > { %p1746_p7 = scmp.ne.s32.totalorder %s2922_s0, %s1745_s26  ;;  %p1752_p12 = scmp.lt.u32.totalorder %s1745_s26, %s2922_s0 }
  0x8f   : > { %p1748_p1 = pnand %p1747_p9, %p1746_p7 }
  0x91   : > { %p1749_p10 = pneg %p1748_p1 }
  0x93   : > { %p1754_p4 = pnand %p1752_p12, %p1749_p10 }
  0x95   : > { %1757 = shalt.err (!%p1754_p4)
}
  0x96   : > { %s2056_s29 = smov [#allocation3]   ;;  %s2923_s10 = sld [smem:[#allocation41_spill]] }
  0x97   : > { %s2924_s2 = sld [smem:[#allocation29_spill]]  ;;  %s2925_s6 = sld [smem:[#allocation28_spill]] }
  0x98   : > { %s2926_s21 = sld [smem:[#allocation34_spill]]  ;;  %p255_p9 = scmp.eq.s32.totalorder %s1299_s27, 11 }
  0x99   : > { %1503 = dma.hbm_to_smem (!%p1501_p8), %s2922_s0, 16, %s2056_s29, [#allocation6]  }
  0x9a   : > { %s284_s23 = sand.u32 1, %s2022_s8   ;;  %p2929_p1 = scmp.eq.s32.totalorder %s2050_s15, 0 }
  0x9c   : > { %p2927_p5 = scmp.eq.s32.totalorder %s2923_s10, 0 }
  0x9d   : > { %p87_p4 = scmp.ne.s32.totalorder %s2022_s8, %s2924_s2  ;;  %p93_p7 = scmp.ne.s32.totalorder %s2924_s2, %s2925_s6 }
  0x9e   : > { %s2427_s4 = scalar_select %p2927_p5, %s2022_s8, %s80_s20  }
  0x9f   : > { %p89_p10 = por %p2929_p1, %p87_p4  ;;  %p2438_p12 = por %p2864_p3, %p93_p7 }
  0xa0   : > { %2928 = sst [smem:[#allocation48_spill]] %s2427_s4  ;;  %p2444_p2 = por %p249_p11, %p87_p4 }
  0xa1   : > { %s2930_s13 = scalar_select %p2438_p12, 1, 0 }
  0xa2   : > { %s2931_s19 = scalar_select %p2444_p2, 1, 0 }
  0xa3   : > { %p2448_p8 = por %p255_p9, %p93_p7  ;;  %s1309_s20 = sshll.u32 %s284_s23, 6 }
  0xa4   : > { %2932 = sst [smem:[#allocation41_spill]] %s2931_s19  ;;  %s1382_s6 = sshll.u32 %s2926_s21, 3 }
  0xa5   : > { %s2933_s29 = scalar_select %p2448_p8, 1, 0 }
  0xa6   : > { %s295_s27 = sadd.s32 %s1382_s6, %s2250_s25  ;;  %s288_s26 = scalar_lea.vmem [#allocation7], %s1309_s20 }
  0xa7   : > { %2934 = sst [smem:[#allocation49_spill]] %s2933_s29  ;;  %s300_s14 = sshll.u32 %s288_s26, 4  ;;  %s2455_s14 = int_to_ptr.vmem [resolvable:$true] %s300_s14 }
  0xa8   : > { %s297_s10 = sadd.s32 %s2253_s16, %s295_s27  ;;  %p2935_p5 = scmp.lt.s32.totalorder %s2050_s15, 12 }
  0xa9   : > { %s1313_s2 = sshll.u32 %s297_s10, 7  ;;  %s2937_s19 = sld [smem:[#allocation51_spill]] }
  0xaa   : > { %p2459_p1 = pnand %p2935_p5, %p89_p10  ;;  %s2468_s21 = scalar_lea.sflag [#allocation4], %s284_s23 }
  0xac   : > { %p1760_p4 = pneg %p2459_p1 }
  0xaf   : > { %s2466_s29 = scalar_lea.hbm %s2937_s19, %s1313_s2  ;;  %s1763_s4 = scalar_lea.hbm %s2937_s19, 12288 }
  0xb0   : > { %s1758_s20 = scalar_lea.hbm %s2466_s29, 1024  ;;  %p1764_p10 = scmp.lt.u32.totalorder %s2466_s29, %s2937_s19 }
  0xb1   : > { %p1759_p11 = scmp.ne.s32.totalorder %s2466_s29, %s1758_s20  ;;  %p1765_p5 = scmp.lt.u32.totalorder %s1763_s4, %s1758_s20 }
  0xb2   : > { %p1767_p8 = scmp.lt.u32.totalorder %s1758_s20, %s2466_s29 }
  0xb3   : > { %p1761_p7 = pnand %p1760_p4, %p1759_p11  ;;  %p1766_p3 = por %p1765_p5, %p1764_p10 }
  0xb5   : > { %p1762_p9 = pneg %p1761_p7  ;;  %p1768_p2 = por %p1767_p8, %p1766_p3 }
  0xb7   : > { %p1769_p13 = pnand %p1768_p2, %p1762_p9 }
  0xb9   : > { %1772 = shalt.err (!%p1769_p13)
}
  0xba   : > { %s1773_s23 = scalar_lea.vmem %s2455_s14, 1024  ;;  %s2057_s10 = smov [#allocation7]  }
  0xbb   : > { %p1774_p11 = scmp.ne.s32.totalorder %s2455_s14, %s1773_s23  ;;  %s1778_s2 = sshll.u32 %s2057_s10, 4  ;;  %s1779_s2 = int_to_ptr.vmem [resolvable:$false] %s1778_s2 }
  0xbc   : > { %s1780_s6 = scalar_lea.vmem %s1779_s2, 2048  ;;  %p1781_p6 = scmp.lt.s32.totalorder %s2455_s14, %s1779_s2 }
  0xbd   : > { %p1776_p7 = pnand %p1774_p11, %p1760_p4  ;;  %p1782_p10 = scmp.lt.s32.totalorder %s1780_s6, %s1773_s23 }
  0xbf   : > { %p1777_p12 = pneg %p1776_p7  ;;  %p1783_p5 = por %p1782_p10, %p1781_p6 }
  0xc1   : > { %p1784_p3 = pnand %p1783_p5, %p1777_p12 }
  0xc3   : > { %1787 = shalt.err (!%p1784_p3)
}
  0xc4   : > { %s2938_s20 = sld [smem:[#allocation43_spill]]  ;;  %s2939_s8 = sld [smem:[#allocation44_spill]] }
  0xc5   : > { %s2940_s4 = sld [smem:[#allocation25_spill]]  ;;  %s2941_s27 = sld [smem:[#allocation24_spill]] }
  0xc6   : > { %s2942_s26 = sld [smem:[#allocation23_spill]]  ;;  %s2943_s23 = sld [smem:[#allocation40_spill]] }
  0xc7   : > { %1507 = dma.hbm_to_vmem [thread:$0]  (!%p2459_p1), %s2466_s29, 1024, %s2455_s14, %s2468_s21, %s2915_s30, %s2915_s30, %s2914_s7  }
  0xc8   : > { %p2946_p8 = scmp.eq.s32.totalorder %s2050_s15, 0  ;;  %p2948_p9 = scmp.eq.s32.totalorder %s2378_s18, 0 }
  0xc9   : > { %s2950_s3 = sld [smem:[#allocation53_spill]]  ;;  %p2951_p7 = scmp.lt.s32.totalorder %s2050_s15, 12 }
  0xca   : > { %p2944_p13 = scmp.lt.s32.totalorder %s2938_s20, 7  ;;  %p2945_p2 = scmp.lt.s32.totalorder %s2939_s8, 7 }
  0xcb   : > { %s156_s0 = sadd.s32 1, %s2940_s4  ;;  %p163_p6 = scmp.ne.s32.totalorder %s2940_s4, %s2941_s27 }
  0xcc   : > { %s3015_s20 = smov (!%p2944_p13, %s2938_s20), 7  ;;  %s3017_s8 = smov (!%p2945_p2, %s2939_s8), 7 }
  0xcd   : > { %s152_s10 = ssub.s32 %s3015_s20, %s3017_s8  ;;  %p169_p12 = scmp.ne.s32.totalorder %s2941_s27, %s2942_s26 }
  0xce   : > { %s153_s2 = sor.u32 %s152_s10, %s2943_s23  ;;  %p2513_p4 = por %p163_p6, %p2946_p8 }
  0xcf   : > { %p154_p1 = scmp.eq.s32.totalorder %s153_s2, 0  ;;  %p2519_p11 = por %p169_p12, %p2948_p9 }
  0xd0   : > { %s341_s14 = sand.u32 1, %s2940_s4   ;;  %s1322_s21 = sshll.u32 %s3015_s20, 1 }
  0xd1   : > { %s2949_s29 = scalar_select %p2519_p11, 1, 0 }
  0xd2   : > { %s3019_s4 = smov (!%p154_p1, %s2940_s4), %s156_s0  ;;  %s1320_s8 = sshll.u32 %s341_s14, 4 }
  0xd3   : > { %s353_s27 = sadd.s32 %s1322_s21, %s2250_s25  ;;  %s343_s10 = scalar_lea.vmem [#allocation10], %s1320_s8 }
  0xd4   : > { %s355_s26 = sadd.s32 %s2253_s16, %s353_s27  ;;  %s358_s19 = sshll.u32 %s343_s10, 4  ;;  %s2534_s19 = int_to_ptr.vmem [resolvable:$true] %s358_s19 }
  0xd5   : > { %s1324_s23 = sshll.u32 %s355_s26, 7  ;;  %p2540_p10 = pnand %p2951_p7, %p2513_p4 }
  0xd6   : > { %s2532_s28 = scalar_lea.hbm %s2950_s3, %s1324_s23  ;;  %s1788_s0 = scalar_lea.hbm %s2337_s11, 256 }
  0xd7   : > { %p1789_p5 = scmp.ne.s32.totalorder %s2337_s11, %s1788_s0  ;;  %p2953_p3 = pneg %p2330_p0 }
  0xd8   : > { %s1793_s22 = scalar_lea.hbm %s2825_s5, 768  ;;  %p1794_p6 = scmp.lt.u32.totalorder %s2337_s11, %s2825_s5 }
  0xd9   : > { %p1791_p13 = pnand %p1789_p5, %p2953_p3  ;;  %p1795_p12 = scmp.lt.u32.totalorder %s1793_s22, %s1788_s0 }
  0xda   : > { %p1797_p4 = scmp.lt.u32.totalorder %s1788_s0, %s2337_s11 }
  0xdb   : > { %p1792_p2 = pneg %p1791_p13  ;;  %p1796_p8 = por %p1795_p12, %p1794_p6 }
  0xdd   : > { %p1798_p1 = por %p1797_p4, %p1796_p8 }
  0xdf   : > { %p1799_p9 = pnand %p1798_p1, %p1792_p2 }
  0xe1   : > { %1802 = shalt.err (!%p1799_p9)
}
  0xe2   : > { %s1803_s6 = scalar_lea.vmem %s2375_s17, 256  ;;  %p2954_p5 = pmov %p2953_p3 }
  0xe3   : > { %p1804_p7 = scmp.ne.s32.totalorder %s2375_s17, %s1803_s6  ;;  %s2058_s8 = smov [#allocation13]  }
  0xe4   : > { %s1808_s27 = sshll.u32 %s2058_s8, 4  ;;  %s1809_s27 = int_to_ptr.vmem [resolvable:$false] %s1808_s27 }
  0xe5   : > { %p1806_p3 = pnand %p1804_p7, %p2954_p5  ;;  %s1810_s26 = scalar_lea.vmem %s1809_s27, 512 }
  0xe6   : > { %p1811_p11 = scmp.lt.s32.totalorder %s2375_s17, %s1809_s27  ;;  %p1812_p6 = scmp.lt.s32.totalorder %s1810_s26, %s1803_s6 }
  0xe7   : > { %p1807_p13 = pneg %p1806_p3 }
  0xe8   : > { %p1813_p12 = por %p1812_p6, %p1811_p11 }
  0xea   : > { %p1814_p8 = pnand %p1813_p12, %p1807_p13 }
  0xec   : > { %1817 = shalt.err (!%p1814_p8)
}
  0xed   : > { %1519 = dma.hbm_to_vmem [thread:$0]  (!%p2330_p0), %s2337_s11, 256, %s2375_s17, %s2343_s1, %s2915_s30, %s2915_s30, %s2914_s7  }
  0xee   : > { %s1818_s23 = scalar_lea.hbm %s2532_s28, 256  ;;  %p1820_p11 = pneg %p2540_p10 }
  0xef   : > { %p1819_p2 = scmp.ne.s32.totalorder %s2532_s28, %s1818_s23  ;;  %s1823_s2 = scalar_lea.hbm %s2950_s3, 12288 }
  0xf0   : > { %p1824_p9 = scmp.lt.u32.totalorder %s2532_s28, %s2950_s3  ;;  %p1825_p7 = scmp.lt.u32.totalorder %s1823_s2, %s1818_s23 }
  0xf1   : > { %p1821_p4 = pnand %p1820_p11, %p1819_p2  ;;  %p1827_p3 = scmp.lt.u32.totalorder %s1818_s23, %s2532_s28 }
  0xf2   : > { %p1826_p5 = por %p1825_p7, %p1824_p9 }
  0xf3   : > { %p1822_p1 = pneg %p1821_p4 }
  0xf4   : > { %p1828_p0 = por %p1827_p3, %p1826_p5 }
  0xf6   : > { %p1829_p13 = pnand %p1828_p0, %p1822_p1 }
  0xf8   : > { %1832 = shalt.err (!%p1829_p13)
}
  0xf9   : > { %s1833_s17 = scalar_lea.vmem %s2534_s19, 256  ;;  %s2059_s11 = smov [#allocation10]  }
  0xfa   : > { %p1834_p6 = scmp.ne.s32.totalorder %s2534_s19, %s1833_s17  ;;  %s1838_s1 = sshll.u32 %s2059_s11, 4  ;;  %s1839_s1 = int_to_ptr.vmem [resolvable:$false] %s1838_s1 }
  0xfb   : > { %s1840_s16 = scalar_lea.vmem %s1839_s1, 512  ;;  %p1841_p2 = scmp.lt.s32.totalorder %s2534_s19, %s1839_s1 }
  0xfc   : > { %p1836_p12 = pnand %p1834_p6, %p1820_p11  ;;  %p1842_p4 = scmp.lt.s32.totalorder %s1840_s16, %s1833_s17 }
  0xfe   : > { %p1837_p8 = pneg %p1836_p12  ;;  %p1843_p9 = por %p1842_p4, %p1841_p2 }
 0x100   : > { %p1844_p7 = pnand %p1843_p9, %p1837_p8 }
 0x102   : > { %1847 = shalt.err (!%p1844_p7)
}
 0x103   : > { %1513 = dma.hbm_to_vmem [thread:$0]  (!%p2540_p10), %s2532_s28, 256, %s2534_s19, %s2276_s12, %s2915_s30, %s2915_s30, %s2914_s7  }
 0x104   : > { %p2955_p11 = scmp.ne.s32.totalorder %s2921_s24, 0 }
 0x105   : > { %p2956_p1 = scmp.eq.s32.totalorder (!%p2955_p11), %s2378_s18, 0 }
 0x106   : > { %412 = sbr.rel (%p2955_p11) target bundleno = 800 (0x320), region = 44 }
 0x10d   : > { %1953 = dma.done.wait (%p2956_p1), [#allocation6], 16   ;;  %p2957_p5 = pmov %p2956_p1 }
 0x10e   : > { %s2958_s22 = sld [smem:[#allocation29_spill]]  ;;  %p2959_p10 = scmp.ne.s32.totalorder %s2930_s13, 0 }
 0x10f   : > { %1955 = vsyncadd (%p2957_p5), [#allocation6], 4294967280 }
 0x114   : > { %s2607_s14 = sand.u32 1, %s2958_s22  }
 0x115   : > { %s1333_s20 = sshll.u32 %s2607_s14, 6  ;;  %s419_s21 = scalar_lea.sflag [#allocation4], %s2607_s14 }
 0x116   : > { %s2613_s28 = scalar_lea.vmem [#allocation7], %s1333_s20 }
 0x117   : > { %1957 = dma.done.wait (%p2959_p10), %s419_s21, 1024  }
 0x118   : > { %1959 = vsyncadd (%p2959_p10), %s419_s21, 4294966272  ;;  %s2960_s12 = sld [smem:[#allocation26_spill]]  ;;  %s2961_s7 = sld [smem:[#allocation46_spill]] }
 0x119   : > { %s427_s30 = sand.u32 1, %s2378_s18  }
 0x11a   : > { %s428_s6 = scalar_lea.sflag [#allocation9], %s427_s30 }
 0x11e   : > { %s429_s24 = sand.u32 1, %s2960_s12   ;;  %p2962_p3 = scmp.ne.s32.totalorder %s2961_s7, 0 }
 0x11f   : > { %s2621_s19 = sshll.u32 %s429_s24, 4 }
 0x120   : > { %s431_s8 = scalar_lea.vmem [#allocation8], %s2621_s19 }
 0x121   : > { %1961 = dma.done.wait (%p2962_p3), %s428_s6, 256  }
 0x122   : > { %1963 = vsyncadd (%p2962_p3), %s428_s6, 4294967040  ;;  %s2963_s27 = sld [smem:[#allocation24_spill]]  ;;  %p2964_p0 = scmp.ne.s32.totalorder %s2949_s29, 0 }
 0x128   : > { %s438_s26 = sand.u32 1, %s2963_s27  }
 0x129   : > { %s2629_s13 = sshll.u32 %s438_s26, 4 }
 0x12a   : > { %s440_s23 = scalar_lea.vmem [#allocation10], %s2629_s13 }
 0x12b   : > { %1965 = dma.done.wait (%p2964_p0), %s428_s6, 256  }
 0x12c   : > { %1967 = vsyncadd (%p2964_p0), %s428_s6, 4294967040  ;;  %s2965_s18 = sld [smem:[#allocation21_spill]]  ;;  %s2966_s9 = sld [smem:[#allocation47_spill]] }
 0x12d   : > { %s446_s0 = scalar_lea.sflag [#allocation12], %s427_s30 }
 0x132   : > { %s447_s10 = sand.u32 1, %s2965_s18   ;;  %p2967_p13 = scmp.ne.s32.totalorder %s2966_s9, 0 }
 0x133   : > { %s2637_s2 = sshll.u32 %s447_s10, 4 }
 0x134   : > { %s449_s25 = scalar_lea.vmem [#allocation11], %s2637_s2 }
 0x135   : > { %1969 = dma.done.wait (%p2967_p13), %s446_s0, 512  }
 0x136   : > { %1971 = vsyncadd (%p2967_p13), %s446_s0, 4294966784  ;;  %s458_s17 = scalar_lea.vmem [#allocation13], %s2637_s2 }
 0x137   : > { %463 = sfence }
 0x138   : > { %s2968_s11 = sld [smem:[#allocation31_spill]]  ;;  %s2969_s1 = sld [smem:[#allocation32_spill]]  ;;  %vm556_vm0 = vcmask 130048   ;;  %v2650_v0 = vld [vmem:[%s449_s25] sm:$0xff]  ;;  %v542_v2 = vld [vmem:[%s2613_s28 + $0x8] sm:$0xff]  ;;  %v1340_v6 = vld [vmem:[%s2613_s28 + $0x18] sm:$0xff] }
 0x139   : > { %1418 = vmatprep.mubr.msk.f32.mxu0 %vm556_vm0, %v2650_v0  ;;  %1425 = vmatprep.mubr.msk.f32.mxu1 %vm556_vm0, %v2650_v0  ;;  %v541_v1 = vld [vmem:[%s2613_s28] sm:$0xff]  ;;  %v1339_v3 = vld [vmem:[%s2613_s28 + $0x10] sm:$0xff]  ;;  %v537_v5 = vld [vmem:[%s431_s8 + $0x8] sm:$0xff]  ;;  %s507_s9 = scalar_lea.vmem [#allocation14], %s1333_s20 }
 0x13a   : > { %v536_v4 = vld [vmem:[%s431_s8] sm:$0xff]  ;;  %v1346_v17 = vld [vmem:[%s2613_s28 + $0x28] sm:$0xff]  ;;  %v1354_v31 = vld [vmem:[%s2613_s28 + $0x38] sm:$0xff]  ;;  %s1090_s0 = sshll.u32 %s507_s9, 4  ;;  %s2725_s0 = int_to_ptr.vmem [resolvable:$true] %s1090_s0 }
 0x13b   : > { %v1345_v11 = vld [vmem:[%s2613_s28 + $0x20] sm:$0xff]  ;;  %v1353_v26 = vld [vmem:[%s2613_s28 + $0x30] sm:$0xff]  ;;  %v842_v45 = vld [vmem:[%s440_s23 + $0x8] sm:$0xff]  ;;  %s2970_s28 = sld [smem:[#allocation33_spill]] }
 0x13c   : > { %v841_v44 = vld [vmem:[%s440_s23] sm:$0xff]  ;;  %v533_v57 = vld [vmem:[%s449_s25 + $0x8] sm:$0xff]  ;;  %s2971_s25 = sld [smem:[#allocation41_spill]] }
 0x13d   : > { %v534_v63 = vld [vmem:[%s458_s17] sm:$0xff] }
 0x13e   : > { %p518_p6 = scmp.gt.s32.totalorder %s2968_s11, 0  ;;  %s524_s29 = smul.u32 3, %s2969_s1 }
 0x13f   : > { %p521_p12 = scmp.lt.s32.totalorder %s2968_s11, 1  ;;  %s1387_s8 = sshll.u32 %s2968_s11, 3 }
 0x140   : > { %s519_s16 = scalar_select %p518_p6, 1, 0 }
 0x141   : > { %s525_s22 = sld [smem:[#allocation3 + %s524_s29]]  ;;  %s526_s21 = sadd.s32 1, %s524_s29 }
 0x142   : > { %s527_s12 = sld [smem:[#allocation3 + %s526_s21]]  ;;  %s520_s7 = scvt.s32.f32 %s519_s16 }
 0x143   : > { %s528_s30 = sadd.s32 2, %s524_s29  ;;  %s1374_s13 = sshll.u32 %s2969_s1, 4 }
 0x144   : > { %s2656_s24 = sld [smem:[#allocation3 + %s528_s30]]  ;;  %s1483_s23 = smul.u32 48, %s2970_s28 }
 0x145   : > { %s2658_s6 = scalar_select %p521_p12, 1, 0 }
 0x146   : > { %s1085_s18 = sadd.s32 %s1387_s8, %s1374_s13  ;;  %s2972_s11 = sld [smem:[#allocation55_spill]] }
 0x147   : > { %s530_s27 = smul.f32 %s525_s22, %s520_s7  ;;  %v642_v7 = vstv %s525_s22  ;;  %s523_s26 = scvt.s32.f32 %s2658_s6 }
 0x148   : > { %v543_v8 = vstv %s527_s12  ;;  %v643_v9 = vmul.f32 %v642_v7, %v541_v1  ;;  %v644_v10 = vmul.f32 %v642_v7, %v542_v2  ;;  %v738_v12 = vmul.f32 %v1339_v3, %v642_v7  ;;  %s1087_s10 = sadd.s32 %s1483_s23, %s1085_s18  ;;  %s1072_s16 = scalar_lea.sflag [#allocation5], %s2607_s14 }
 0x149   : > { %v538_v13 = vstv %s530_s27  ;;  %v544_v14 = vmul.f32 %v543_v8, %v541_v1  ;;  %v545_v15 = vmul.f32 %v543_v8, %v542_v2  ;;  %v647_v16 = vmul.f32 %v1339_v3, %v543_v8  ;;  %v535_v1 = vld [vmem:[%s458_s17 + $0x8] sm:$0xff]  ;;  %s1375_s2 = sshll.u32 %s1087_s10, 7  ;;  %s1848_s22 = scalar_lea.vmem %s2725_s0, 1024 }
 0x14a   : > { %v539_v18 = vmul.f32 %v538_v13, %v536_v4  ;;  %v540_v19 = vmul.f32 %v538_v13, %v537_v5  ;;  %v551_v20 = vstv %s2656_s24  ;;  %v648_v21 = vmul.f32 %v1340_v6, %v543_v8  ;;  %s531_s19 = smul.f32 %s2656_s24, %s523_s26  ;;  %p1849_p8 = scmp.ne.s32.totalorder %s2725_s0, %s1848_s22 }
 0x14b   : > { %v552_v22 = vmul.f32 %v1339_v3, %v551_v20  ;;  %v553_v23 = vmul.f32 %v1340_v6, %v551_v20  ;;  %v649_v24 = vadd.f32 %v647_v16, %v643_v9  ;;  %v654_v25 = vmul.f32 %v1345_v11, %v551_v20  ;;  %p2974_p2 = scmp.ne.s32.totalorder %s2971_s25, 0  ;;  %s2060_s21 = smov [#allocation14]  }
 0x14c   : > { %v546_v27 = vadd.f32 %v544_v14, %v539_v18  ;;  %v547_v28 = vadd.f32 %v545_v15, %v540_v19  ;;  %v650_v29 = vadd.f32 %v648_v21, %v644_v10  ;;  %v655_v30 = vmul.f32 %v1346_v17, %v551_v20  ;;  %s2973_s1 = smov %s2972_s11  ;;  %s2723_s29 = scalar_lea.hbm %s2972_s11, %s1375_s2 }
 0x14d   : > { %v656_v32 = vadd.f32 %v654_v25, %v649_v24  ;;  %v739_v33 = vmul.f32 %v1340_v6, %v642_v7  ;;  %v742_v34 = vmul.f32 %v1345_v11, %v543_v8  ;;  %v743_v35 = vmul.f32 %v1346_v17, %v543_v8  ;;  %p1850_p4 = pnand %p1849_p8, %p2974_p2  ;;  %s1852_s12 = sshll.u32 %s2060_s21, 4  ;;  %s1853_s12 = int_to_ptr.vmem [resolvable:$false] %s1852_s12 }
 0x14e   : > { %v554_v36 = vadd.f32 %v552_v22, %v546_v27  ;;  %v555_v37 = vadd.f32 %v553_v23, %v547_v28  ;;  %v657_v38 = vadd.f32 %v655_v30, %v650_v29  ;;  %v749_v39 = vmul.f32 %v1353_v26, %v551_v20  ;;  %s1854_s7 = scalar_lea.vmem %s1853_s12, 2048  ;;  %p1855_p7 = scmp.lt.s32.totalorder %s2725_s0, %s1853_s12 }
 0x14f   : > { %v744_v40 = vadd.f32 %v742_v34, %v738_v12  ;;  %v745_v41 = vadd.f32 %v743_v35, %v739_v33  ;;  %v750_v42 = vmul.f32 %v1354_v31, %v551_v20  ;;  %v833_v43 = vmul.f32 %v1345_v11, %v642_v7  ;;  %p1851_p9 = pneg %p1850_p4  ;;  %p1856_p11 = scmp.lt.s32.totalorder %s1854_s7, %s1848_s22 }
 0x150   : > { %v1458_v46 = vpack.c.bf16 %v555_v37, %v554_v36  ;;  %v1462_v47 = vpack.c.bf16 %v657_v38, %v656_v32  ;;  %v834_v48 = vmul.f32 %v1346_v17, %v642_v7  ;;  %v837_v49 = vmul.f32 %v1353_v26, %v543_v8 }
 0x151   : > { %v751_v50 = vadd.f32 %v749_v39, %v744_v40  ;;  %v752_v51 = vadd.f32 %v750_v42, %v745_v41  ;;  %v838_v52 = vmul.f32 %v1354_v31, %v543_v8  ;;  %v843_v53 = vstv %s531_s19  ;;  %p1857_p1 = por %p1856_p11, %p1855_p7 }
 0x152   : > { %1459 = vmatprep.subr.bf16.mxu0 %v1458_v46  ;;  %1463 = vmatprep.subr.bf16.mxu1 %v1462_v47  ;;  %v839_v54 = vadd.f32 %v837_v49, %v833_v43  ;;  %v844_v55 = vmul.f32 %v843_v53, %v841_v44  ;;  %v845_v56 = vmul.f32 %v843_v53, %v842_v45 }
 0x153   : > { %1461 = vmatpush3.bf16.msra.mxu0 %v1458_v46  ;;  %v1466_v58 = vpack.c.bf16 %v752_v51, %v751_v50  ;;  %1465 = vmatpush3.bf16.msra.mxu1 %v1462_v47  ;;  %v840_v59 = vadd.f32 %v838_v52, %v834_v48  ;;  %v1474_v2 = vpack.c.bf16 %v535_v1, %v534_v63  ;;  %p1858_p5 = pnand %p1857_p1, %p1851_p9 }
 0x154   : > { %v846_v60 = vadd.f32 %v844_v55, %v839_v54 }
 0x155   : > { %1467 = vmatprep.subr.bf16.mxu0 %v1466_v58  ;;  %v847_v61 = vadd.f32 %v845_v56, %v840_v59 }
 0x156   : > { %1419 = vmatmul.mubr.msk.f32.vlgmr.msra.gmra.mrb[0].mxu0 %vm556_vm0, %v533_v57  ;;  %1426 = vmatmul.mubr.msk.f32.vlgmr.msra.gmra.mrb[0].mxu1 %vm556_vm0, %v533_v57 }
 0x157   : > { %1469 = vmatpush3.bf16.msra.mxu0 %v1466_v58  ;;  %1432 = vmatprep.mubr.msk.f32.mxu0 %vm556_vm0, %v2650_v0  ;;  %v1470_v62 = vpack.c.bf16 %v847_v61, %v846_v60 }
 0x158   : > { %1439 = vmatprep.mubr.msk.f32.mxu1 %vm556_vm0, %v2650_v0  ;;  %1475 = vmatprep.subr.bf16.mxu0 %v1474_v2 }
 0x159   : > { %1471 = vmatprep.subr.bf16.mxu1 %v1470_v62 }
 0x15a   : > { %1433 = vmatmul.mubr.msk.f32.vlgmr.msra.gmra.mrb[2].mxu0 %vm556_vm0, %v533_v57  ;;  %1473 = vmatpush3.bf16.msra.mxu1 %v1470_v62 }
 0x15b   : > { %1478 = vmatprep.subr.bf16.mxu1 %v1474_v2  ;;  %1477 = vmatpush3.bf16.msra.mxu0 %v1474_v2 }
 0x15d   : > { %1440 = vmatmul.mubr.msk.f32.vlgmr.msra.gmra.mrb[2].mxu1 %vm556_vm0, %v533_v57 }
 0x15e   : > { %1479 = vmatpush3.bf16.msra.mxu1 %v1474_v2 }
 0x229   : > { %v1420_v3 = vpop.f32.mrb[0].mxu0  ;;  %v1427_v4 = vpop.f32.mrb[0].mxu1 }
 0x22a   : > { %639 = vst.msk [vmem:[#allocation2 + $0x8] sm:$0xff] %vm556_vm0, %v1420_v3  ;;  %v629_v0 = vpop.f32.mrb[1].mxu0  ;;  %735 = vst.msk [vmem:[#allocation2 + $0x18] sm:$0xff] %vm556_vm0, %v1427_v4  ;;  %v724_v5 = vpop.f32.mrb[1].mxu1 }
 0x22b   : > { %638 = vst.msk [vmem:[#allocation2] sm:$0xff] %vm556_vm0, %v629_v0  ;;  %734 = vst.msk [vmem:[#allocation2 + $0x10] sm:$0xff] %vm556_vm0, %v724_v5 }
 0x22d   : > { %v1434_v6 = vpop.f32.mrb[2].mxu0 }
 0x22e   : > { %830 = vst.msk [vmem:[#allocation2 + $0x28] sm:$0xff] %vm556_vm0, %v1434_v6  ;;  %v819_v7 = vpop.f32.mrb[3].mxu0 }
 0x22f   : > { %829 = vst.msk [vmem:[#allocation2 + $0x20] sm:$0xff] %vm556_vm0, %v819_v7 }
 0x230   : > { %v1441_v8 = vpop.f32.mrb[2].mxu1 }
 0x231   : > { %925 = vst.msk [vmem:[#allocation2 + $0x38] sm:$0xff] %vm556_vm0, %v1441_v8  ;;  %v914_v9 = vpop.f32.mrb[3].mxu1  ;;  %v927_v12 = vld [vmem:[#allocation2 + $0x8] sm:$0xff]  ;;  %v929_v14 = vld [vmem:[#allocation2 + $0x18] sm:$0xff] }
 0x232   : > { %924 = vst.msk [vmem:[#allocation2 + $0x30] sm:$0xff] %vm556_vm0, %v914_v9  ;;  %v926_v10 = vld [vmem:[#allocation2] sm:$0xff]  ;;  %v928_v11 = vld [vmem:[#allocation2 + $0x10] sm:$0xff] }
 0x233   : > { %1446 = vmatprep.mubr.msk.f32.mxu0 %vm556_vm0, %v926_v10 }
 0x234   : > { %1447 = vmatmul.mubr.msk.f32.vlgmr.msra.gmra.mrb[4].mxu0 %vm556_vm0, %v927_v12 }
 0x235   : > { %1449 = vmatprep.mubr.msk.f32.mxu0 %vm556_vm0, %v928_v11  ;;  %v931_v15 = vld [vmem:[#allocation2 + $0x28] sm:$0xff] }
 0x236   : > { %v930_v13 = vld [vmem:[#allocation2 + $0x20] sm:$0xff] }
 0x237   : > { %1452 = vmatprep.mubr.msk.f32.mxu1 %vm556_vm0, %v930_v13 }
 0x238   : > { %1450 = vmatmul.mubr.msk.f32.gmra.mrb[6].mxu0 %vm556_vm0, %v929_v14  ;;  %1453 = vmatmul.mubr.msk.f32.vlgmr.msra.gmra.mrb[4].mxu1 %vm556_vm0, %v931_v15  ;;  %v933_v17 = vld [vmem:[#allocation2 + $0x38] sm:$0xff] }
 0x239   : > { %v932_v16 = vld [vmem:[#allocation2 + $0x30] sm:$0xff] }
 0x23a   : > { %1455 = vmatprep.mubr.msk.f32.mxu1 %vm556_vm0, %v932_v16 }
 0x23c   : > { %1456 = vmatmul.mubr.msk.f32.gmra.mrb[6].mxu1 %vm556_vm0, %v933_v17 }
 0x307   : > { %v1448_v18 = vpop.f32.mrb[4].mxu0 }
 0x308   : > { %1064 = vst.msk [vmem:[%s507_s9 + $0x8] sm:$0xff] %vm556_vm0, %v1448_v18  ;;  %v1024_v19 = vpop.f32.mrb[5].mxu0 }
 0x309   : > { %1063 = vst.msk [vmem:[%s507_s9] sm:$0xff] %vm556_vm0, %v1024_v19 }
 0x30b   : > { %v1451_v20 = vpop.f32.mrb[6].mxu0  ;;  %v1454_v21 = vpop.f32.mrb[4].mxu1 }
 0x30c   : > { %1066 = vst.msk [vmem:[%s507_s9 + $0x18] sm:$0xff] %vm556_vm0, %v1451_v20  ;;  %1068 = vst.msk [vmem:[%s507_s9 + $0x28] sm:$0xff] %vm556_vm0, %v1454_v21  ;;  %v1034_v22 = vpop.f32.mrb[7].mxu0  ;;  %v1044_v23 = vpop.f32.mrb[5].mxu1 }
 0x30d   : > { %1065 = vst.msk [vmem:[%s507_s9 + $0x10] sm:$0xff] %vm556_vm0, %v1034_v22  ;;  %1067 = vst.msk [vmem:[%s507_s9 + $0x20] sm:$0xff] %vm556_vm0, %v1044_v23 }
 0x30f   : > { %v1457_v24 = vpop.f32.mrb[6].mxu1 }
 0x310   : > { %1070 = vst.msk [vmem:[%s507_s9 + $0x38] sm:$0xff] %vm556_vm0, %v1457_v24  ;;  %v1054_v25 = vpop.f32.mrb[7].mxu1 }
 0x311   : > { %1069 = vst.msk [vmem:[%s507_s9 + $0x30] sm:$0xff] %vm556_vm0, %v1054_v25 }
 0x312   : > { %1861 = shalt.err (!%p1858_p5)
}
 0x313   : > { %s1862_s30 = scalar_lea.hbm %s2723_s29, 1024  ;;  %s1866_s27 = scalar_lea.hbm %s2973_s1, 12288 }
 0x314   : > { %p1863_p10 = scmp.ne.s32.totalorder %s2723_s29, %s1862_s30  ;;  %p1867_p13 = scmp.lt.u32.totalorder %s2723_s29, %s2973_s1 }
 0x315   : > { %p1868_p6 = scmp.lt.u32.totalorder %s1866_s27, %s1862_s30  ;;  %p1870_p8 = scmp.lt.u32.totalorder %s1862_s30, %s2723_s29 }
 0x316   : > { %p1864_p3 = pnand %p1863_p10, %p2974_p2 }
 0x317   : > { %p1869_p12 = por %p1868_p6, %p1867_p13 }
 0x318   : > { %p1865_p0 = pneg %p1864_p3 }
 0x319   : > { %p1871_p4 = por %p1870_p8, %p1869_p12 }
 0x31b   : > { %p1872_p9 = pnand %p1871_p4, %p1865_p0 }
 0x31d   : > { %1875 = shalt.err (!%p1872_p9)
}
 0x31e   : > { %s2061_s28 = smov 128   ;;  %s2062_s8 = smov 8  }
 0x31f   : > { %1498 = dma.vmem_to_hbm [thread:$0]  (%p2974_p2), %s2725_s0, 1024, %s2723_s29, %s1072_s16, %s2061_s28, %s2061_s28, %s2062_s8  }
 0x320 PF: > { %s2975_s13 = sld [smem:[#allocation28_spill]]  ;;  %s2976_s23 = sld [smem:[#allocation49_spill]] }
 0x321   : > { %p1527_p7 = scmp.ge.s32.totalorder %s2050_s15, 2 }
 0x326   : > { %s1105_s18 = sand.u32 1, %s2975_s13   ;;  %p2977_p11 = scmp.ne.s32.totalorder %s2976_s23, 0 }
 0x327   : > { %s1106_s9 = scalar_lea.sflag [#allocation5], %s1105_s18 }
 0x328   : > { %p1521_p1 = pnand %p1527_p7, %p2977_p11 }
 0x32a   : > { %1973 = dma.done.wait (!%p1521_p1), %s1106_s9, 1024  }
 0x32b   : > { %1975 = vsyncadd (!%p1521_p1), %s1106_s9, 4294966272  ;;  %s29_s15 = sadd.s32 1, %s2050_s15   ;;  %s2979_s21 = sld [smem:[#allocation21_spill]] }
 0x32c   : > { %p2758_p5 = scmp.ge.s32.totalorder %s29_s15, 14   ;;  %s2980_s22 = sld [smem:[#allocation22_spill]] }
 0x32d   : > { %s2981_s23 = sld [smem:[#allocation45_spill]]  ;;  %s2982_s24 = sld [smem:[#allocation24_spill]] }
 0x32e   : > { %s2983_s25 = sld [smem:[#allocation25_spill]]  ;;  %s2984_s27 = sld [smem:[#allocation26_spill]] }
 0x32f   : > { %s2985_s28 = sld [smem:[#allocation27_spill]]  ;;  %s2986_s29 = sld [smem:[#allocation42_spill]] }
 0x330   : > { %s2987_s30 = sld [smem:[#allocation29_spill]]  ;;  %s2988_s7 = sld [smem:[#allocation30_spill]] }
 0x331   : > { %s2989_s8 = sld [smem:[#allocation48_spill]]  ;;  %s2991_s14 = sld [smem:[#allocation35_spill]] }
 0x332   : > { %s2990_s9 = sld [smem:[#allocation34_spill]]  ;;  %s2992_s11 = sld [smem:[#allocation36_spill]] }
 0x333   : > { %s2993_s12 = sld [smem:[#allocation37_spill]]  ;;  %s2994_s13 = sld [smem:[#allocation38_spill]] }
 0x334   : > { %s2995_s2 = sld [smem:[#allocation39_spill]]  ;;  %s2997_s26 = smov %s3019_s4 }
 0x335   :  { %28 = sbr.rel (!%p2758_p5) target bundleno = 25 (0x19), region = 148 }
 0x337   : > { %s2998_s10 = smov %s2991_s14 }
 0x33a   : > { %s2999_s14 = smov %s2995_s2 }
 0x33c   :  { %1111 = vsyncpa [#allocation4], 1 }
 0x33d   :  { %1113 = vsyncpa [#allocation4 + $0x1], 1 }
 0x33e   :  { %1114 = vsyncpa [#allocation9], 1 }
 0x33f   :  { %1116 = vsyncpa [#allocation9 + $0x1], 1 }
 0x340   :  { %1117 = vsyncpa [#allocation12], 1 }
 0x341   :  { %1119 = vsyncpa [#allocation12 + $0x1], 1 }
 0x342   :  { %1120 = vsyncpa [#allocation5], 1 }
 0x343   :  { %1122 = vsyncpa [#allocation5 + $0x1], 1 }
 0x344   :  { %1123 = vsyncpa [#allocation6], 1 }
 0x345   :  { %1125 = vsyncpa [#allocation6 + $0x1], 1 }

</bundles_post_ra>
